<compile_context>
chip_gen: v7x
topology: tpu7x:2x2x1
jax: 0.10.0
libtpu: 0.0.40
codegen_flags: <defaults>
</compile_context>

<pallas_src>
import jax
import jax.numpy as jnp
from jax.experimental import pallas as pl
from jax.experimental.pallas import tpu as pltpu


def _round_up(x, m):
    return ((x + m - 1) // m) * m


def _choose_tile_n(N, tile_n_max=1024):
    """Lane-dense node tile: multiple of 128, >=~6 grid steps when N allows."""
    if N <= 128:
        return _round_up(max(N, 1), 128)
    # >= ~6 steps so the v7x megacore (2 TCs sharing the "parallel" axis) gets
    # >= 3 pipelined steps per core; never below one 128-lane vreg width.
    cap = max(128, ((N // 6) // 128) * 128)
    return min(_round_up(tile_n_max, 128), cap)


def _pnn_kernel(x_ref, w_ref, o_ref):
    """One fused MXU dot per node tile.

    x_ref : (K_pad, tile_n)  stacked [dists ; sf_sum^T ; ones ; 0-pad]  (streaming dtype)
    w_ref : (E, K_pad)       fused   [anchor_proj^T/A | W2/A | b | 0]  (streaming dtype)
    o_ref : (E, tile_n)      out^T tile, f32
    """
    o_ref[...] = jnp.dot(w_ref[...], x_ref[...], preferred_element_type=jnp.float32)


def pnn_forward_pallas(anchorset_id, dists_array, embeds, W, b, *,
                       tile_n_max=1024, streaming_dtype=jnp.float32):
    """PNNLayer.forward — operand folding in JAX, fused streamed matmul in Pallas.

    Torch semantics per node i and anchor a:
        messages[i, a, :] = anchor_emb[a] * dists.T[i, a]
        cat(messages, self_feature) -> Linear(2E, E) -> mean over a
    Algebraically identical, feature-major, fully fused form:
        out^T = [W1 @ anchor_emb^T / A | W2 / A | b] @ [dists ; sf_sum^T ; 1]
    with sf_sum[i] = sum_a embeds[(i*A + a) % N]  (torch's tiled self_feature).
    """
    A, N = dists_array.shape
    E = embeds.shape[1]

    embeds_f32 = embeds.astype(jnp.float32)
    dists = jnp.asarray(dists_array, jnp.float32)                  # (A, N)
    anchor_emb = embeds_f32[anchorset_id]                          # (A, E)

    # self_feature sum over anchors: exact sum of A circular gathers (avoids the
    # prefix-sum cancellation issue at large N; A is small).
    idx0 = (jnp.arange(N, dtype=jnp.int32) * A) % N
    sf_sum = embeds_f32[idx0]
    for a in range(1, A):
        sf_sum = sf_sum + embeds_f32[(idx0 + a) % N]               # (N, E)

    # Fold Linear(2E, E), the 1/A anchor-mean and the bias into one weight.
    W1 = W[:, :E].astype(jnp.float32)                              # anchor half
    W2 = W[:, E:].astype(jnp.float32)                              # self half
    inv_A = 1.0 / A
    K = A + E + 1                                                  # + bias row
    K_pad = _round_up(K, 16)                                       # sublane-friendly for f32 & bf16

    wf = jnp.zeros((E, K_pad), jnp.float32)
    wf = wf.at[:, :A].set((W1 @ anchor_emb.T) * inv_A)             # (E, A)
    wf = wf.at[:, A:A + E].set(W2 * inv_A)                         # (E, E)
    wf = wf.at[:, A + E].set(b.astype(jnp.float32))                # bias column
    wf = wf.astype(streaming_dtype)

    tile_n = _choose_tile_n(N, tile_n_max)
    N_pad = _round_up(N, tile_n)

    # Single fused streaming operand, built directly at padded size.
    x = jnp.zeros((K_pad, N_pad), streaming_dtype)
    x = x.at[:A, :N].set(dists.astype(streaming_dtype))
    x = x.at[A:A + E, :N].set(sf_sum.T.astype(streaming_dtype))
    x = x.at[A + E, :N].set(jnp.asarray(1.0, streaming_dtype))     # bias "ones" row

    out_t = pl.pallas_call(
        _pnn_kernel,
        out_shape=jax.ShapeDtypeStruct((E, N_pad), jnp.float32),
        grid=(N_pad // tile_n,),
        in_specs=[
            pl.BlockSpec((K_pad, tile_n), lambda i: (0, i)),       # streamed, lane-dense
            pl.BlockSpec((E, K_pad), lambda i: (0, 0)),            # grid-invariant weight
        ],
        out_specs=pl.BlockSpec((E, tile_n), lambda i: (0, i)),     # lane-dense stores
        compiler_params=pltpu.CompilerParams(
            dimension_semantics=("parallel",),                     # megacore-shard node axis
            vmem_limit_bytes=32 * 1024 * 1024),
    )(x, wf)

    # Module returns row-major (N, E) embeds: one XLA transpose+slice.
    return out_t[:, :N].T


def local_graph_forward(adj_rows, adj_cols, embeds, *, anchorset_id, dists_array,
                        W, b, num_users, num_items, add_rate=0.01, key=None,
                        streaming_dtype=jnp.bfloat16):
    """LocalGraph.forward equivalent (minus the externally injected gt_layer)."""
    N = num_users + num_items

    # 1) embeds = self.pnn(anchorset_id, dists_array, embeds)  -- Pallas kernel
    pnn_embeds = pnn_forward_pallas(anchorset_id, dists_array, embeds, W, b,
                                    streaming_dtype=streaming_dtype)

    # 2) random edge augmentation + sparse coalesce (host-style glue, no Pallas).
    if key is None:
        key = jax.random.PRNGKey(0)
    k1, k2 = jax.random.split(key)
    n_add = int(adj_rows.shape[0] * add_rate)
    if n_add > 0:
        add_rows = jax.random.choice(k1, adj_rows, shape=(n_add,))
        add_cols = jax.random.choice(k2, adj_cols, shape=(n_add,))
    else:
        add_rows = jnp.zeros((0,), dtype=adj_rows.dtype)
        add_cols = jnp.zeros((0,), dtype=adj_cols.dtype)
    self_loops = jnp.arange(N, dtype=adj_rows.dtype)
    new_rows = jnp.concatenate([add_rows, add_cols, self_loops, adj_rows])
    new_cols = jnp.concatenate([add_cols, add_rows, self_loops, adj_cols])
    # Dense equivalent of sp.csr_matrix((ones,(rows,cols))) -> sparse_coo.coalesce().
    add_adj = jnp.zeros((N, N), jnp.float32).at[new_rows, new_cols].add(1.0)

    # TODO(synk): `self.gt_layer` (GTLayer) is externally injected and its code is
    # not part of the provided module, so embeds_l2 / atten / att_edge cannot be
    # computed faithfully here.
    return pnn_embeds, add_adj


def pnn_reference(anchorset_id, dists_array, embeds, W, b):
    """Pure-JAX transcription of PNNLayer.forward (torch op-for-op)."""
    A, N = dists_array.shape
    E = embeds.shape[1]
    set_ids_emb = embeds[anchorset_id]
    set_ids_reshape = jnp.tile(set_ids_emb, (N, 1)).reshape(-1, A, E)
    dists_array_emb = jnp.asarray(dists_array, jnp.float32).T[:, :, None]
    messages = set_ids_reshape * dists_array_emb
    self_feature = jnp.tile(embeds, (A, 1)).reshape(-1, A, E)
    messages = jnp.concatenate([messages, self_feature], axis=-1)
    messages = messages @ W.T + b
    return jnp.mean(messages, axis=1)


if __name__ == "__main__":
    key = jax.random.PRNGKey(0)
    ks = jax.random.split(key, 8)

    num_users, num_items = 120, 180
    N = num_users + num_items          # 300 nodes -> 3 lane-dense tiles of 128
    dim_E = 32
    anchor_set_num = 8

    embeds = jax.random.normal(ks[0], (N, dim_E), jnp.float32)
    anchorset_id = jnp.arange(0, N, N // anchor_set_num, dtype=jnp.int32)[:anchor_set_num]
    # "1/(dist+1)" style distances in (0, 1]
    dists_array = jax.random.uniform(ks[1], (anchor_set_num, N), jnp.float32)

    # nn.Linear(2*dim_E, dim_E) parameters, deterministic init
    bound = 1.0 / float(jnp.sqrt(2.0 * dim_E))
    W = jax.random.uniform(ks[2], (dim_E, 2 * dim_E), jnp.float32, -bound, bound)
    b = jax.random.uniform(ks[3], (dim_E,), jnp.float32, -bound, bound)

    # small bipartite user->item edge list (global node indices)
    n_edges = 200
    adj_rows = jax.random.randint(ks[4], (n_edges,), 0, num_users).astype(jnp.int32)
    adj_cols = (jax.random.randint(ks[5], (n_edges,), 0, num_items)
                + num_users).astype(jnp.int32)

    ref = pnn_reference(anchorset_id, dists_array, embeds, W, b)

    # f32 streaming mode: bit-for-bit-faithful math, tight tolerance.
    pnn_f32 = pnn_forward_pallas(anchorset_id, dists_array, embeds, W, b,
                                 streaming_dtype=jnp.float32)
    jax.block_until_ready(pnn_f32)
    assert pnn_f32.shape == (N, dim_E)
    err_f32 = float(jnp.max(jnp.abs(pnn_f32 - ref)))
    assert bool(jnp.allclose(pnn_f32, ref, atol=1e-4, rtol=1e-4)), \
        f"PNN kernel (f32 streaming) mismatch (max abs err {err_f32})"

    # bf16 streaming mode (default production path): half the HBM bytes.
    pnn_out, add_adj = local_graph_forward(
        adj_rows, adj_cols, embeds,
        anchorset_id=anchorset_id, dists_array=dists_array, W=W, b=b,
        num_users=num_users, num_items=num_items, add_rate=0.01, key=ks[6],
        streaming_dtype=jnp.bfloat16)
    jax.block_until_ready((pnn_out, add_adj))
    assert pnn_out.shape == (N, dim_E)
    assert add_adj.shape == (N, N)
    err_bf16 = float(jnp.max(jnp.abs(pnn_out - ref)))
    assert bool(jnp.allclose(pnn_out, ref, atol=1e-2, rtol=1e-2)), \
        f"PNN kernel (bf16 streaming) mismatch (max abs err {err_bf16})"

    print("KERNEL_OK")
</pallas_src>

<mosaic_0001>
module attributes {stable_mosaic.version = 11 : i64} {
  func.func @_pnn_kernel(%arg0: i32, %arg1: memref<48x128xf32, #tpu.memory_space<vmem>>, %arg2: memref<32x48xf32, #tpu.memory_space<vmem>>, %arg3: memref<32x128xf32, #tpu.memory_space<vmem>>) attributes {dimension_semantics = [#tpu.dimension_semantics<parallel>], iteration_bounds = array<i64: 3>, scalar_prefetch = 0 : i64, scratch_operands = 0 : i64, tpu.core_type = #tpu.core_type<tc>, window_params = [{transform_indices = @transform_0, window_bounds = array<i64: 48, 128>}, {pipeline_mode = #tpu.pipeline_mode<synchronous>, transform_indices = @transform_1, window_bounds = array<i64: 32, 48>}, {transform_indices = @transform_2, window_bounds = array<i64: 32, 128>}]} {
    %c0 = arith.constant 0 : index
    %c0_0 = arith.constant 0 : index
    %0 = vector.load %arg2[%c0, %c0_0] : memref<32x48xf32, #tpu.memory_space<vmem>>, vector<32x48xf32>
    %c0_1 = arith.constant 0 : index
    %c0_2 = arith.constant 0 : index
    %1 = vector.load %arg1[%c0_1, %c0_2] : memref<48x128xf32, #tpu.memory_space<vmem>>, vector<48x128xf32>
    %cst = arith.constant dense<0.000000e+00> : vector<32x128xf32>
    %2 = tpu.matmul %0, %1, %cst {dimension_numbers = #tpu.dot_dimension_numbers<[1], [0], [0], [1], [0, 0, 1, 1], [], []>} : vector<32x48xf32>, vector<48x128xf32>, vector<32x128xf32> -> vector<32x128xf32>
    %c0_3 = arith.constant 0 : index
    %c0_4 = arith.constant 0 : index
    %3 = vector.load %arg3[%c0_3, %c0_4] : memref<32x128xf32, #tpu.memory_space<vmem>>, vector<32x128xf32>
    tpu.vector_store %arg3[%c0_3, %c0_4], %2 {strides = array<i32>} : memref<32x128xf32, #tpu.memory_space<vmem>>, vector<32x128xf32>,
    return
  }
  func.func @transform_0(%arg0: i32) -> (i32, i32) {
    %c0_i32 = arith.constant 0 : i32
    %c0_i32_0 = arith.constant 0 : i32
    return %c0_i32, %arg0 : i32, i32
  }
  func.func @transform_1(%arg0: i32) -> (i32, i32) {
    %c0_i32 = arith.constant 0 : i32
    %c0_i32_0 = arith.constant 0 : i32
    %c0_i32_1 = arith.constant 0 : i32
    return %c0_i32, %c0_i32_0 : i32, i32
  }
  func.func @transform_2(%arg0: i32) -> (i32, i32) {
    %c0_i32 = arith.constant 0 : i32
    %c0_i32_0 = arith.constant 0 : i32
    return %c0_i32, %arg0 : i32, i32
  }
}

</mosaic_0001>

<bundles_post_ra>
// kernel: tpu_custom_call.1
= control target key start
LH: loop header
LB: loop body
LE: loop exit
PB: predicated region body
PF: predicated region fallthrough
CT: control target
= control target key end

     0   :  { %7 = vsyncpa [#allocation3], 0  ;;  %s873_s0 = inlined_call_operand.hbm [shape: f32[48,384], index: 0, kind: input, shape index: {}]   ;;  %s874_s1 = inlined_call_operand.hbm [shape: f32[32,48], index: 1, kind: input, shape index: {}]   ;;  %s875_s2 = inlined_call_operand.hbm [shape: f32[32,384], index: 2, kind: output, shape index: {}]  }
   0x1   :  { %9 = vsyncpa [#allocation3 + $0x1], 0 }
   0x2   :  { %10 = vsyncpa [#allocation6], 0 }
   0x3   :  { %11 = vsyncpa [#allocation4], 0 }
   0x4   :  { %13 = vsyncpa [#allocation4 + $0x1], 0  ;;  %s665_s9 = smov 0   ;;  %s667_s10 = smov 0  }
   0x5   :  { %s669_s11 = smov 0   ;;  %s671_s12 = smov 0  }
   0x6 LB: > { %s686_s13 = sadd.s32 4294967295, %s639_s12   ;;  %s384_s14 = sadd.s32 4294967294, %s639_s12   ;;  %s639_s12 = sphi %s671_s12, %s898_s12   ;;  %s635_s11 = sphi %s669_s11, %s897_s11   ;;  %s631_s10 = sphi %s667_s10, %s896_s10   ;;  %s627_s9 = sphi %s665_s9, %s895_s9  }
   0x7   : > { %s690_s15 = sadd.s32 1, %s639_s12   ;;  %s26_s16 = sadd.s32 1, %s635_s11 }
   0x8   : > { %s23_s17 = ssub.s32 %s639_s12, %s690_s15  ;;  %p33_p0 = scmp.ne.s32.totalorder %s635_s11, %s631_s10 }
   0x9   : > { %p24_p1 = scmp.eq.s32.totalorder %s23_s17, 0  ;;  %p34_p2 = scmp.eq.s32.totalorder %s639_s12, 0 }
   0xa   : > { %p39_p3 = scmp.ne.s32.totalorder %s631_s10, %s627_s9  ;;  %p876_p4 = scmp.eq.s32.totalorder %s686_s13, 0 }
   0xb   : > { %s702_s18 = scalar_select %p24_p1, %s635_s11, %s26_s16  }
   0xc   : > { %p704_p5 = por %p34_p2, %p33_p0  ;;  %p710_p6 = por %p876_p4, %p39_p3 }
   0xd   : > { %p84_p7 = scmp.eq.s32.totalorder %s686_s13, 2  ;;  %p90_p8 = scmp.eq.s32.totalorder %s384_s14, 2 }
   0xe   : > { %s880_s19 = scalar_select %p704_p5, 1, 0 }
   0xf   : > { %s881_s20 = scalar_select %p710_p6, 1, 0 }
  0x10   : > { %p385_p9 = scmp.ge.s32.totalorder %s639_s12, 1  ;;  %p97_p10 = scmp.lt.s32.totalorder %s639_s12, 4 }
  0x11   : > { %p717_p11 = por %p84_p7, %p33_p0  ;;  %p721_p12 = por %p90_p8, %p39_p3 }
  0x12   : > { %p725_p13 = pnand %p385_p9, %p97_p10  ;;  %s641_s24 = smov [#allocation5]  }
  0x13   : > { %s882_s21 = scalar_select %p717_p11, 1, 0 }
  0x14   : > { %s883_s22 = scalar_select %p721_p12, 1, 0 }
  0x15   : > { %s884_s23 = scalar_select %p725_p13, 1, 0 }
  0x16   : > { %p456_p1 = pneg %p725_p13  ;;  %s109_s25 = sshll.u32 %s641_s24, 4  ;;  %s110_s25 = int_to_ptr.vmem [resolvable:$true] %s109_s25 }
  0x17   : > { %s123_s27 = sand.u32 1, %s635_s11   ;;  %s511_s30 = scalar_lea.hbm %s874_s1, 512 }
  0x18   : > { %p733_p2 = pnand %p456_p1, %p876_p4  ;;  %p512_p3 = scmp.ne.s32.totalorder %s874_s1, %s511_s30 }
  0x19   : > { %p518_p10 = scmp.lt.u32.totalorder %s511_s30, %s874_s1 }
  0x1a   : > { %p513_p7 = pneg %p733_p2 }
  0x1c   : > { %p514_p8 = pnand %p513_p7, %p512_p3 }
  0x1e   : > { %p515_p9 = pneg %p514_p8 }
  0x20   : > { %p520_p1 = pnand %p518_p10, %p515_p9 }
  0x22   : > { %523 = shalt.err (!%p520_p1)
}
  0x23   : > { %s524_s7 = scalar_lea.vmem %s110_s25, 512  ;;  %p532_p11 = scmp.lt.s32.totalorder %s110_s25, %s110_s25 }
  0x24   : > { %p525_p4 = scmp.ne.s32.totalorder %s110_s25, %s524_s7  ;;  %p533_p6 = scmp.lt.s32.totalorder %s524_s7, %s524_s7 }
  0x26   : > { %p527_p0 = pnand %p525_p4, %p513_p7  ;;  %p534_p13 = por %p533_p6, %p532_p11 }
  0x28   : > { %p528_p12 = pneg %p527_p0 }
  0x2a   : > { %p535_p5 = pnand %p534_p13, %p528_p12 }
  0x2c   : > { %538 = shalt.err (!%p535_p5)
}
  0x2d   : > { %s642_s8 = smov 128   ;;  %s643_s14 = smov 8  }
  0x2e   : > { %459 = dma.hbm_to_vmem [thread:$0]  (!%p733_p2), %s874_s1, 512, %s110_s25, [#allocation6], %s642_s8, %s642_s8, %s643_s14  }
  0x2f   : > { %p886_p4 = scmp.ne.s32.totalorder %s880_s19, 0  ;;  %p887_p0 = scmp.lt.s32.totalorder %s639_s12, 3 }
  0x30   : > { %s446_s28 = smul.u32 48, %s123_s27  ;;  %s388_s29 = sshll.u32 %s639_s12, 7 }
  0x31   : > { %p762_p3 = pnand %p887_p0, %p886_p4  ;;  %s770_s26 = scalar_lea.hbm %s873_s0, %s388_s29 }
  0x32   : > { %s127_s25 = scalar_lea.vmem [#allocation2], %s446_s28  ;;  %s774_s4 = scalar_lea.sflag [#allocation3], %s123_s27 }
  0x33   : > { %s133_s19 = sshll.u32 %s127_s25, 4  ;;  %s539_s5 = scalar_lea.hbm %s770_s26, 768  ;;  %s772_s19 = int_to_ptr.vmem [resolvable:$true] %s133_s19 }
  0x34   : > { %p540_p5 = scmp.ne.s32.totalorder %s770_s26, %s539_s5  ;;  %p541_p6 = pneg %p762_p3 }
  0x35   : > { %s544_s16 = scalar_lea.hbm %s873_s0, 2304  ;;  %p545_p13 = scmp.lt.u32.totalorder %s770_s26, %s873_s0 }
  0x36   : > { %p542_p11 = pnand %p541_p6, %p540_p5  ;;  %p546_p2 = scmp.lt.u32.totalorder %s544_s16, %s539_s5 }
  0x37   : > { %p548_p8 = scmp.lt.u32.totalorder %s539_s5, %s770_s26 }
  0x38   : > { %p543_p12 = pneg %p542_p11  ;;  %p547_p7 = por %p546_p2, %p545_p13 }
  0x3a   : > { %p549_p9 = por %p548_p8, %p547_p7 }
  0x3c   : > { %p550_p10 = pnand %p549_p9, %p543_p12 }
  0x3e   : > { %553 = shalt.err (!%p550_p10)
}
  0x3f   : > { %s554_s27 = scalar_lea.vmem %s772_s19, 768  ;;  %s644_s28 = smov [#allocation2]  }
  0x40   : > { %p555_p1 = scmp.ne.s32.totalorder %s772_s19, %s554_s27  ;;  %s559_s30 = sshll.u32 %s644_s28, 4  ;;  %s560_s30 = int_to_ptr.vmem [resolvable:$false] %s559_s30 }
  0x41   : > { %s561_s3 = scalar_lea.vmem %s560_s30, 1536  ;;  %p562_p5 = scmp.lt.s32.totalorder %s772_s19, %s560_s30 }
  0x42   : > { %p557_p4 = pnand %p555_p1, %p541_p6  ;;  %p563_p11 = scmp.lt.s32.totalorder %s561_s3, %s554_s27 }
  0x44   : > { %p558_p0 = pneg %p557_p4  ;;  %p564_p13 = por %p563_p11, %p562_p5 }
  0x46   : > { %p565_p2 = pnand %p564_p13, %p558_p0 }
  0x48   : > { %568 = shalt.err (!%p565_p2)
}
  0x49   : > { %s645_s25 = smov 384   ;;  %p889_p6 = scmp.ne.s32.totalorder %s884_s23, 0 }
  0x4a   : > { %463 = dma.hbm_to_vmem [thread:$0]  (!%p762_p3), %s770_s26, 768, %s772_s19, %s774_s4, %s645_s25, %s642_s8, %s643_s14  }
  0x4b   : > { %145 = sbr.rel (%p889_p6) target bundleno = 330 (0x14a), region = 28  ;;  %s807_s5 = sand.u32 (!%p889_p6), 1, %s631_s10  }
  0x4c   : > { %s447_s6 = smul.u32 (!%p889_p6), 48, %s807_s5  ;;  %s148_s7 = scalar_lea.sflag (!%p889_p6), [#allocation3], %s807_s5 }
  0x4d   : > { %p890_p12 = scmp.ne.s32.totalorder (!%p889_p6), %s881_s20, 0 }
  0x4e   : > { %s151_s16 = scalar_lea.vmem (!%p889_p6), [#allocation2], %s447_s6 }
  0x52   : > { %614 = dma.done.wait (%p890_p12), %s148_s7, 768  }
  0x53   : > { %616 = vsyncadd (%p890_p12), %s148_s7, 4294966528  ;;  %p891_p7 = scmp.eq.s32.totalorder %s686_s13, 0 }
  0x55   : > { %618 = dma.done.wait (%p891_p7), [#allocation6], 512   ;;  %p892_p3 = pmov %p891_p7 }
  0x56   : > { %v180_v0 = vld [vmem:[%s151_s16] sm:$0xff]  ;;  %v181_v1 = vld [vmem:[%s151_s16 + $0x8] sm:$0xff]  ;;  %v182_v2 = vld [vmem:[%s151_s16 + $0x10] sm:$0xff]  ;;  %vm186_vm0 = vcmask 392192   ;;  %s391_s20 = sshll.u32 %s807_s5, 5  ;;  %s397_s14 = sshll.u32 %s686_s13, 7 }
  0x57   : > { %620 = vsyncadd (%p892_p3), [#allocation6], 4294966784  ;;  %v428_v3 = vpack.c.bf16 %v181_v1, %v180_v0  ;;  %v183_v4 = vld [vmem:[%s151_s16 + $0x18] sm:$0xff]  ;;  %v184_v6 = vld [vmem:[%s151_s16 + $0x20] sm:$0xff]  ;;  %s175_s23 = scalar_lea.vmem [#allocation7], %s391_s20  ;;  %s830_s19 = scalar_lea.hbm %s875_s2, %s397_s14 }
  0x58   : > { %v432_v5 = vpack.c.bf16 %v183_v4, %v182_v2  ;;  %v185_v7 = vld [vmem:[%s151_s16 + $0x28] sm:$0xff]  ;;  %v176_v8 = vld [vmem:[#allocation5] sm:$0xff]  ;;  %v178_v9 = vld [vmem:[#allocation5 + $0x10] sm:$0xff]  ;;  %s301_s8 = sshll.u32 %s175_s23, 4  ;;  %s289_s4 = scalar_lea.sflag [#allocation4], %s807_s5  ;;  %s825_s8 = int_to_ptr.vmem [resolvable:$true] %s301_s8 }
  0x59   : > { %429 = vmatprep.subr.bf16.mxu0 %v428_v3  ;;  %440 = vmatprep.subr.bf16.mxu1 %v428_v3  ;;  %v436_v10 = vpack.c.bf16 %v185_v7, %v184_v6  ;;  %v177_v11 = vld [vmem:[#allocation5 + $0x8] sm:$0xff]  ;;  %v179_v12 = vld [vmem:[#allocation5 + $0x18] sm:$0xff]  ;;  %s569_s13 = scalar_lea.vmem %s825_s8, 512  ;;  %p893_p9 = scmp.ne.s32.totalorder %s882_s21, 0 }
  0x5a   : > { %431 = vmatpush3.bf16.msra.mxu0 %v428_v3  ;;  %443 = vmatpush3.bf16.msra.mxu1 %v428_v3  ;;  %p570_p8 = scmp.ne.s32.totalorder %s825_s8, %s569_s13  ;;  %s646_s17 = smov [#allocation7]  }
  0x5b   : > { %433 = vmatprep.subr.bf16.mxu0 %v432_v5  ;;  %441 = vmatprep.subr.bf16.mxu1 %v432_v5  ;;  %s573_s29 = sshll.u32 %s646_s17, 4  ;;  %s574_s29 = int_to_ptr.vmem [resolvable:$false] %s573_s29 }
  0x5c   : > { %422 = vmatprep.mubr.msk.f32.mxu0 %vm186_vm0, %v176_v8  ;;  %425 = vmatprep.mubr.msk.f32.mxu1 %vm186_vm0, %v178_v9  ;;  %p571_p10 = pnand %p570_p8, %p893_p9  ;;  %s575_s27 = scalar_lea.vmem %s574_s29, 1024 }
  0x5d   : > { %p576_p4 = scmp.lt.s32.totalorder %s825_s8, %s574_s29  ;;  %p577_p0 = scmp.lt.s32.totalorder %s575_s27, %s569_s13 }
  0x5e   : > { %435 = vmatpush3.bf16.msra.mxu0 %v432_v5  ;;  %444 = vmatpush3.bf16.msra.mxu1 %v432_v5  ;;  %p572_p1 = pneg %p571_p10 }
  0x5f   : > { %437 = vmatprep.subr.bf16.mxu0 %v436_v10  ;;  %442 = vmatprep.subr.bf16.mxu1 %v436_v10  ;;  %p578_p5 = por %p577_p0, %p576_p4 }
  0x61   : > { %p579_p11 = pnand %p578_p5, %p572_p1 }
  0x62   : > { %439 = vmatpush3.bf16.msra.mxu0 %v436_v10  ;;  %445 = vmatpush3.bf16.msra.mxu1 %v436_v10 }
  0x65   : > { %423 = vmatmul.mubr.msk.f32.vlgmr.msra.gmra.mrb[0].mxu0 %vm186_vm0, %v177_v11  ;;  %426 = vmatmul.mubr.msk.f32.vlgmr.msra.gmra.mrb[0].mxu1 %vm186_vm0, %v179_v12 }
 0x138   : > { %v424_v13 = vpop.f32.mrb[0].mxu0  ;;  %v427_v14 = vpop.f32.mrb[0].mxu1 }
 0x139   : > { %285 = vst [vmem:[%s175_s23 + $0x8] sm:$0xff] %v424_v13  ;;  %287 = vst [vmem:[%s175_s23 + $0x18] sm:$0xff] %v427_v14  ;;  %v265_v15 = vpop.f32.mrb[1].mxu0  ;;  %v275_v16 = vpop.f32.mrb[1].mxu1 }
 0x13a   : > { %284 = vst [vmem:[%s175_s23] sm:$0xff] %v265_v15  ;;  %286 = vst [vmem:[%s175_s23 + $0x10] sm:$0xff] %v275_v16 }
 0x13b   : > { %582 = shalt.err (!%p579_p11)
}
 0x13c   : > { %s583_s28 = scalar_lea.hbm %s830_s19, 512  ;;  %s587_s25 = scalar_lea.hbm %s875_s2, 1536 }
 0x13d   : > { %p584_p13 = scmp.ne.s32.totalorder %s830_s19, %s583_s28  ;;  %p588_p12 = scmp.lt.u32.totalorder %s830_s19, %s875_s2 }
 0x13e   : > { %p589_p7 = scmp.lt.u32.totalorder %s587_s25, %s583_s28  ;;  %p591_p8 = scmp.lt.u32.totalorder %s583_s28, %s830_s19 }
 0x13f   : > { %p585_p2 = pnand %p584_p13, %p893_p9 }
 0x140   : > { %p590_p3 = por %p589_p7, %p588_p12 }
 0x141   : > { %p586_p6 = pneg %p585_p2 }
 0x142   : > { %p592_p10 = por %p591_p8, %p590_p3 }
 0x144   : > { %p593_p1 = pnand %p592_p10, %p586_p6 }
 0x146   : > { %596 = shalt.err (!%p593_p1)
}
 0x147   : > { %s647_s16 = smov 128   ;;  %s648_s20 = smov 384  }
 0x148   : > { %s649_s23 = smov 8  }
 0x149   : > { %454 = dma.vmem_to_hbm [thread:$0]  (%p893_p9), %s825_s8, 512, %s830_s19, %s289_s4, %s647_s16, %s648_s20, %s649_s23  }
 0x14a PF: > { %p471_p4 = scmp.ge.s32.totalorder %s639_s12, 2  ;;  %s316_s14 = sand.u32 1, %s627_s9  }
 0x14b   : > { %p894_p0 = scmp.ne.s32.totalorder %s883_s22, 0  ;;  %s317_s24 = scalar_lea.sflag [#allocation4], %s316_s14 }
 0x14d   : > { %p465_p5 = pnand %p471_p4, %p894_p0 }
 0x14f   : > { %622 = dma.done.wait (!%p465_p5), %s317_s24, 512  }
 0x150   : > { %624 = vsyncadd (!%p465_p5), %s317_s24, 4294966784  ;;  %p16_p11 = scmp.ge.s32.totalorder %s690_s15, 5   ;;  %s895_s9 = smov %s631_s10 }
 0x151   : > { %s896_s10 = smov %s635_s11  ;;  %s897_s11 = smov %s702_s18 }
 0x152   : > { %s898_s12 = smov %s690_s15  ;;  %18 = sbr.rel (!%p16_p11) target bundleno = 6 (0x6), region = 77 }
 0x159   :  { %322 = vsyncpa [#allocation3], 1 }
 0x15a   :  { %324 = vsyncpa [#allocation3 + $0x1], 1 }
 0x15b   :  { %325 = vsyncpa [#allocation6], 1 }
 0x15c   :  { %326 = vsyncpa [#allocation4], 1 }
 0x15d   :  { %328 = vsyncpa [#allocation4 + $0x1], 1 }

</bundles_post_ra>
